<compile_context>
chip_gen: v5e
topology: v5e:2x2
jax: 0.10.0
libtpu: 0.0.40
codegen_flags: <defaults>
</compile_context>

<pallas_src>
import jax
import jax.numpy as jnp
from jax.experimental import pallas as pl
from jax.experimental.pallas import tpu as pltpu


def _make_cpe_kernel(H, W, C, TH):
    WC = W * C

    def kernel(x_ref, w_ref, b_ref, o_ref):
        # x_ref: (H, W*C)      full input, resident in VMEM across the grid
        # w_ref: (3, 3, W*C)   depthwise weights (W borders + residual folded in)
        # b_ref: (1, W*C)      bias, lane-tiled over W (f32)
        # o_ref: (TH, W*C)     output rows [i*TH, i*TH + TH)
        i = pl.program_id(0)
        r0 = pl.multiple_of(i * TH, TH)

        # Centre rows (kept in the input dtype; promoted at the multiply).
        xc = x_ref[pl.ds(r0, TH), :]

        # +-1 row halo, zeroed at the global top/bottom image border.
        top = x_ref[pl.ds(jnp.maximum(r0 - 1, 0), 1), :]
        top = jnp.where(r0 > 0, top, jnp.zeros_like(top))
        bot = x_ref[pl.ds(jnp.minimum(r0 + TH, H - 1), 1), :]
        bot = jnp.where(r0 + TH < H, bot, jnp.zeros_like(bot))

        # One padded buffer; the three dh-shifted sources are slices of it.
        xpad = jnp.concatenate([top, xc, bot], axis=0)        # (TH+2, WC)

        w_all = w_ref[...]                                    # (3, 3, WC) f32
        acc = b_ref[...]                                      # (1, WC) f32; broadcasts on first add

        for dh in range(3):
            xh = xpad[dh:dh + TH]                             # row r -> x[r0 + r + dh - 1]
            # A +-1 pixel shift along W is a +-C lane roll.  The wrapped
            # first/last pixel column lands on a zeroed weight tap (padding was
            # folded into w_flat at init), so no lane masks are needed here.
            left = pltpu.roll(xh, shift=C, axis=1)            # source column j-1
            right = pltpu.roll(xh, shift=WC - C, axis=1)      # source column j+1
            acc = acc + left * w_all[dh, 0:1, :]              # dw = 0
            acc = acc + xh * w_all[dh, 1:2, :]                # dw = 1 (+ residual)
            acc = acc + right * w_all[dh, 2:3, :]             # dw = 2

        o_ref[...] = acc.astype(o_ref.dtype)

    return kernel


def prepare_cpe_params(weight_oihw, bias_c, W):
    """One-time (module-init) parameter prep — hoisted out of the per-call path.

    Builds lane-tiled (over W) f32 weights/bias with:
      * the 3x3 zero padding along W folded in (border taps zeroed), and
      * the "+x" residual folded into the centre tap (+= 1),
    so the kernel is a pure 9-tap multiply-add.  Note: wrapped border data is
    multiplied by a 0 weight rather than select-masked; this only differs from
    masking if border-adjacent activations are Inf/NaN (0 * Inf = NaN).
    """
    C = bias_c.shape[0]
    w_33c = jnp.transpose(weight_oihw[:, 0, :, :], (1, 2, 0)).astype(jnp.float32)  # (3, 3, C)
    w_33c = w_33c.at[1, 1, :].add(1.0)                    # residual: x + conv(x)
    w_flat = jnp.broadcast_to(w_33c[:, :, None, :], (3, 3, W, C))
    w_flat = w_flat.at[:, 0, 0, :].set(0.0)               # dw=0 tap at output column 0
    w_flat = w_flat.at[:, 2, W - 1, :].set(0.0)           # dw=2 tap at output column W-1
    w_flat = w_flat.reshape(3, 3, W * C)
    b_flat = jnp.broadcast_to(bias_c.astype(jnp.float32)[None, :], (W, C)).reshape(1, W * C)
    return w_flat, b_flat


def _choose_row_tile(H, WC, itemsize, budget_bytes=8 * 1024 * 1024):
    """Largest divisor-of-H row tile whose per-tile VMEM stays within budget.

    TH steps by the dtype's sublane packing (8 for 4B, 16 for 2B, 32 for 1B) so
    the (TH, WC) output block stays an unpadded whole-vreg tile (no masked vst
    on the writeback path, no padded sublane shuffles on the halo slices).
    """
    step = {4: 8, 2: 16, 1: 32}.get(itemsize, 8)
    # Per output row: double-buffered writeback tile + ~5 f32 temporaries
    # (xpad slice, two rolled copies, accumulator, headroom).
    per_row = 2 * WC * itemsize + 5 * WC * 4
    best = H
    th = step
    while th * 2 <= H:
        if H % th == 0 and th * per_row <= budget_bytes:
            best = th
        th += step
    return best


def _vmem_limit_bytes(H, WC, TH, itemsize):
    """Footprint-driven scoped-VMEM limit instead of a hardcoded 32 MiB."""
    resident_in = 2 * H * WC * itemsize            # full input block (worst case: double-buffered)
    out_tiles = 2 * TH * WC * itemsize             # pipelined writeback tile
    params = 2 * 10 * WC * 4                       # (3,3,WC) weights + (1,WC) bias
    f32_temps = 6 * (TH + 2) * WC * 4              # xpad / rolls / accumulator
    total = resident_in + out_tiles + params + f32_temps + (4 << 20)
    # Clamp to v7x's 64 MiB/TC so the same request is valid on every target.
    return max(min(total, 64 * 1024 * 1024), 16 * 1024 * 1024)


def cpe_pos_embb_forward(x_hwc, w_flat, b_flat):
    """x_hwc: (H, W, C); w_flat/b_flat from prepare_cpe_params. Returns (H, W, C)."""
    H, W, C = x_hwc.shape
    WC = W * C
    assert w_flat.shape == (3, 3, WC) and b_flat.shape == (1, WC)

    x2 = x_hwc.reshape(H, WC)                      # lane-dense view (contiguous -> free)
    itemsize = x_hwc.dtype.itemsize
    TH = _choose_row_tile(H, WC, itemsize)
    grid = (H // TH,)

    out2 = pl.pallas_call(
        _make_cpe_kernel(H, W, C, TH),
        out_shape=jax.ShapeDtypeStruct((H, WC), x_hwc.dtype),
        grid=grid,
        in_specs=[
            # Full input resident across the grid (constant index map -> fetched
            # from HBM once); every output row-tile slices its +-1 row halo.
            # TODO(synk): for feature maps too large for v7x's 64 MiB/TC VMEM,
            # switch to memory_space=pl.ANY + manually double-buffered
            # (TH+2)-row halo-slab DMAs (also avoids each TensorCore pulling
            # its own full copy of x under the 2-TC "parallel" split), and/or
            # single-buffer the grid-constant blocks.
            pl.BlockSpec((H, WC), lambda i: (0, 0)),
            pl.BlockSpec((3, 3, WC), lambda i: (0, 0, 0)),
            pl.BlockSpec((1, WC), lambda i: (0, 0)),
        ],
        out_specs=pl.BlockSpec((TH, WC), lambda i: (i, 0)),
        compiler_params=pltpu.CompilerParams(
            dimension_semantics=("parallel",),     # v7x: shard row tiles over 2 TCs
            vmem_limit_bytes=_vmem_limit_bytes(H, WC, TH, itemsize),
        ),
    )(x2, w_flat, b_flat)
    return out2.reshape(H, W, C)


def _reference(x_hwc, w_oihw, bias_c):
    """Pure-JAX reference mirroring the PyTorch forward exactly."""
    C = x_hwc.shape[-1]
    x_chw = jnp.transpose(x_hwc, (2, 0, 1))          # permute(2,0,1)
    conv = jax.lax.conv_general_dilated(
        x_chw[None],                                  # (1, C, H, W)
        w_oihw,                                       # (C, 1, 3, 3)
        window_strides=(1, 1),
        padding=((1, 1), (1, 1)),
        dimension_numbers=("NCHW", "OIHW", "NCHW"),
        feature_group_count=C,
    )[0] + bias_c[:, None, None]
    y_chw = x_chw + conv
    return jnp.transpose(y_chw, (1, 2, 0))            # permute(1,2,0)


if __name__ == "__main__":
    key = jax.random.PRNGKey(0)
    k_x, k_w, k_b = jax.random.split(key, 3)

    H, W, d_model = 16, 16, 32

    # Conv2d(d_model, d_model, 3, padding=1, groups=d_model) parameters:
    #   weight: (d_model, 1, 3, 3), bias: (d_model,)
    w_oihw = jax.random.normal(k_w, (d_model, 1, 3, 3), jnp.float32) * 0.1
    bias = jax.random.normal(k_b, (d_model,), jnp.float32) * 0.1
    x = jax.random.normal(k_x, (H, W, d_model), jnp.float32)

    # Module-init-time parameter prep (borders + residual folded into weights).
    w_flat, b_flat = prepare_cpe_params(w_oihw, bias, W)

    out = jax.block_until_ready(cpe_pos_embb_forward(x, w_flat, b_flat))
    ref = _reference(x, w_oihw, bias)

    assert out.shape == (H, W, d_model)
    err = float(jnp.max(jnp.abs(out - ref)))
    assert jnp.allclose(out, ref, atol=1e-4, rtol=1e-4), err

    print("KERNEL_OK")
</pallas_src>

<mosaic_0001>
module attributes {stable_mosaic.version = 11 : i64} {
  func.func @kernel(%arg0: i32, %arg1: memref<16x512xf32, #tpu.memory_space<vmem>>, %arg2: memref<3x3x512xf32, #tpu.memory_space<vmem>>, %arg3: memref<1x512xf32, #tpu.memory_space<vmem>>, %arg4: memref<8x512xf32, #tpu.memory_space<vmem>>) attributes {dimension_semantics = [#tpu.dimension_semantics<parallel>], iteration_bounds = array<i64: 2>, scalar_prefetch = 0 : i64, scratch_operands = 0 : i64, tpu.core_type = #tpu.core_type<tc>, window_params = [{pipeline_mode = #tpu.pipeline_mode<synchronous>, transform_indices = @transform_0, window_bounds = array<i64: 16, 512>}, {pipeline_mode = #tpu.pipeline_mode<synchronous>, transform_indices = @transform_1, window_bounds = array<i64: 3, 3, 512>}, {pipeline_mode = #tpu.pipeline_mode<synchronous>, transform_indices = @transform_2, window_bounds = array<i64: 1, 512>}, {transform_indices = @transform_3, window_bounds = array<i64: 8, 512>}]} {
    %c8_i32 = arith.constant 8 : i32
    %0 = arith.muli %arg0, %c8_i32 : i32
    %1 = tpu.assume_multiple %0, 8 : i32
    %2 = arith.index_cast %1 : i32 to index
    %c0 = arith.constant 0 : index
    %3 = vector.load %arg1[%2, %c0] : memref<16x512xf32, #tpu.memory_space<vmem>>, vector<8x512xf32>
    %c1_i32 = arith.constant 1 : i32
    %4 = arith.subi %1, %c1_i32 : i32
    %c0_i32 = arith.constant 0 : i32
    %5 = arith.maxsi %4, %c0_i32 : i32
    %6 = arith.index_cast %5 : i32 to index
    %c0_0 = arith.constant 0 : index
    %7 = vector.load %arg1[%6, %c0_0] : memref<16x512xf32, #tpu.memory_space<vmem>>, vector<1x512xf32>
    %c0_i32_1 = arith.constant 0 : i32
    %8 = arith.cmpi sgt, %1, %c0_i32_1 : i32
    %cst = arith.constant 0.000000e+00 : f32
    %9 = vector.broadcast %cst : f32 to vector<1x512xf32>
    %10 = arith.select %8, %7, %9 : vector<1x512xf32>
    %c8_i32_2 = arith.constant 8 : i32
    %11 = arith.addi %1, %c8_i32_2 : i32
    %c15_i32 = arith.constant 15 : i32
    %12 = arith.minsi %11, %c15_i32 : i32
    %13 = arith.index_cast %12 : i32 to index
    %c0_3 = arith.constant 0 : index
    %14 = vector.load %arg1[%13, %c0_3] : memref<16x512xf32, #tpu.memory_space<vmem>>, vector<1x512xf32>
    %c8_i32_4 = arith.constant 8 : i32
    %15 = arith.addi %1, %c8_i32_4 : i32
    %c16_i32 = arith.constant 16 : i32
    %16 = arith.cmpi slt, %15, %c16_i32 : i32
    %cst_5 = arith.constant 0.000000e+00 : f32
    %17 = vector.broadcast %cst_5 : f32 to vector<1x512xf32>
    %18 = arith.select %16, %14, %17 : vector<1x512xf32>
    %19 = tpu.concatenate %10, %3, %18 in 0 : vector<1x512xf32>, vector<8x512xf32>, vector<1x512xf32> -> vector<10x512xf32>
    %c0_6 = arith.constant 0 : index
    %c0_7 = arith.constant 0 : index
    %c0_8 = arith.constant 0 : index
    %20 = vector.load %arg2[%c0_6, %c0_7, %c0_8] : memref<3x3x512xf32, #tpu.memory_space<vmem>>, vector<3x3x512xf32>
    %c0_9 = arith.constant 0 : index
    %c0_10 = arith.constant 0 : index
    %21 = vector.load %arg3[%c0_9, %c0_10] : memref<1x512xf32, #tpu.memory_space<vmem>>, vector<1x512xf32>
    %22 = vector.extract_strided_slice %19 {offsets = [0, 0], sizes = [8, 512], strides = [1, 1]} : vector<10x512xf32> to vector<8x512xf32>
    %c32_i32 = arith.constant 32 : i32
    %23 = tpu.dynamic_rotate %22 by %c32_i32 dim 1 : vector<8x512xf32>, i32 -> vector<8x512xf32>
    %c480_i32 = arith.constant 480 : i32
    %24 = tpu.dynamic_rotate %22 by %c480_i32 dim 1 : vector<8x512xf32>, i32 -> vector<8x512xf32>
    %25 = vector.extract_strided_slice %20 {offsets = [0, 0, 0], sizes = [1, 1, 512], strides = [1, 1, 1]} : vector<3x3x512xf32> to vector<1x1x512xf32>
    %26 = vector.shape_cast %25 : vector<1x1x512xf32> to vector<1x512xf32>
    %27 = vector.broadcast %26 : vector<1x512xf32> to vector<8x512xf32>
    %28 = arith.mulf %23, %27 : vector<8x512xf32>
    %29 = vector.broadcast %21 : vector<1x512xf32> to vector<8x512xf32>
    %30 = arith.addf %29, %28 : vector<8x512xf32>
    %31 = vector.extract_strided_slice %20 {offsets = [0, 1, 0], sizes = [1, 1, 512], strides = [1, 1, 1]} : vector<3x3x512xf32> to vector<1x1x512xf32>
    %32 = vector.shape_cast %31 : vector<1x1x512xf32> to vector<1x512xf32>
    %33 = vector.broadcast %32 : vector<1x512xf32> to vector<8x512xf32>
    %34 = arith.mulf %22, %33 : vector<8x512xf32>
    %35 = arith.addf %30, %34 : vector<8x512xf32>
    %36 = vector.extract_strided_slice %20 {offsets = [0, 2, 0], sizes = [1, 1, 512], strides = [1, 1, 1]} : vector<3x3x512xf32> to vector<1x1x512xf32>
    %37 = vector.shape_cast %36 : vector<1x1x512xf32> to vector<1x512xf32>
    %38 = vector.broadcast %37 : vector<1x512xf32> to vector<8x512xf32>
    %39 = arith.mulf %24, %38 : vector<8x512xf32>
    %40 = arith.addf %35, %39 : vector<8x512xf32>
    %41 = vector.extract_strided_slice %19 {offsets = [1, 0], sizes = [8, 512], strides = [1, 1]} : vector<10x512xf32> to vector<8x512xf32>
    %c32_i32_11 = arith.constant 32 : i32
    %42 = tpu.dynamic_rotate %41 by %c32_i32_11 dim 1 : vector<8x512xf32>, i32 -> vector<8x512xf32>
    %c480_i32_12 = arith.constant 480 : i32
    %43 = tpu.dynamic_rotate %41 by %c480_i32_12 dim 1 : vector<8x512xf32>, i32 -> vector<8x512xf32>
    %44 = vector.extract_strided_slice %20 {offsets = [1, 0, 0], sizes = [1, 1, 512], strides = [1, 1, 1]} : vector<3x3x512xf32> to vector<1x1x512xf32>
    %45 = vector.shape_cast %44 : vector<1x1x512xf32> to vector<1x512xf32>
    %46 = vector.broadcast %45 : vector<1x512xf32> to vector<8x512xf32>
    %47 = arith.mulf %42, %46 : vector<8x512xf32>
    %48 = arith.addf %40, %47 : vector<8x512xf32>
    %49 = vector.extract_strided_slice %20 {offsets = [1, 1, 0], sizes = [1, 1, 512], strides = [1, 1, 1]} : vector<3x3x512xf32> to vector<1x1x512xf32>
    %50 = vector.shape_cast %49 : vector<1x1x512xf32> to vector<1x512xf32>
    %51 = vector.broadcast %50 : vector<1x512xf32> to vector<8x512xf32>
    %52 = arith.mulf %41, %51 : vector<8x512xf32>
    %53 = arith.addf %48, %52 : vector<8x512xf32>
    %54 = vector.extract_strided_slice %20 {offsets = [1, 2, 0], sizes = [1, 1, 512], strides = [1, 1, 1]} : vector<3x3x512xf32> to vector<1x1x512xf32>
    %55 = vector.shape_cast %54 : vector<1x1x512xf32> to vector<1x512xf32>
    %56 = vector.broadcast %55 : vector<1x512xf32> to vector<8x512xf32>
    %57 = arith.mulf %43, %56 : vector<8x512xf32>
    %58 = arith.addf %53, %57 : vector<8x512xf32>
    %59 = vector.extract_strided_slice %19 {offsets = [2, 0], sizes = [8, 512], strides = [1, 1]} : vector<10x512xf32> to vector<8x512xf32>
    %c32_i32_13 = arith.constant 32 : i32
    %60 = tpu.dynamic_rotate %59 by %c32_i32_13 dim 1 : vector<8x512xf32>, i32 -> vector<8x512xf32>
    %c480_i32_14 = arith.constant 480 : i32
    %61 = tpu.dynamic_rotate %59 by %c480_i32_14 dim 1 : vector<8x512xf32>, i32 -> vector<8x512xf32>
    %62 = vector.extract_strided_slice %20 {offsets = [2, 0, 0], sizes = [1, 1, 512], strides = [1, 1, 1]} : vector<3x3x512xf32> to vector<1x1x512xf32>
    %63 = vector.shape_cast %62 : vector<1x1x512xf32> to vector<1x512xf32>
    %64 = vector.broadcast %63 : vector<1x512xf32> to vector<8x512xf32>
    %65 = arith.mulf %60, %64 : vector<8x512xf32>
    %66 = arith.addf %58, %65 : vector<8x512xf32>
    %67 = vector.extract_strided_slice %20 {offsets = [2, 1, 0], sizes = [1, 1, 512], strides = [1, 1, 1]} : vector<3x3x512xf32> to vector<1x1x512xf32>
    %68 = vector.shape_cast %67 : vector<1x1x512xf32> to vector<1x512xf32>
    %69 = vector.broadcast %68 : vector<1x512xf32> to vector<8x512xf32>
    %70 = arith.mulf %59, %69 : vector<8x512xf32>
    %71 = arith.addf %66, %70 : vector<8x512xf32>
    %72 = vector.extract_strided_slice %20 {offsets = [2, 2, 0], sizes = [1, 1, 512], strides = [1, 1, 1]} : vector<3x3x512xf32> to vector<1x1x512xf32>
    %73 = vector.shape_cast %72 : vector<1x1x512xf32> to vector<1x512xf32>
    %74 = vector.broadcast %73 : vector<1x512xf32> to vector<8x512xf32>
    %75 = arith.mulf %61, %74 : vector<8x512xf32>
    %76 = arith.addf %71, %75 : vector<8x512xf32>
    %c0_15 = arith.constant 0 : index
    %c0_16 = arith.constant 0 : index
    %77 = vector.load %arg4[%c0_15, %c0_16] : memref<8x512xf32, #tpu.memory_space<vmem>>, vector<8x512xf32>
    tpu.vector_store %arg4[%c0_15, %c0_16], %76 {strides = array<i32>} : memref<8x512xf32, #tpu.memory_space<vmem>>, vector<8x512xf32>,
    return
  }
  func.func @transform_0(%arg0: i32) -> (i32, i32) {
    %c0_i32 = arith.constant 0 : i32
    %c0_i32_0 = arith.constant 0 : i32
    %c0_i32_1 = arith.constant 0 : i32
    return %c0_i32, %c0_i32_0 : i32, i32
  }
  func.func @transform_1(%arg0: i32) -> (i32, i32, i32) {
    %c0_i32 = arith.constant 0 : i32
    %c0_i32_0 = arith.constant 0 : i32
    %c0_i32_1 = arith.constant 0 : i32
    %c0_i32_2 = arith.constant 0 : i32
    return %c0_i32, %c0_i32_0, %c0_i32_1 : i32, i32, i32
  }
  func.func @transform_2(%arg0: i32) -> (i32, i32) {
    %c0_i32 = arith.constant 0 : i32
    %c0_i32_0 = arith.constant 0 : i32
    %c0_i32_1 = arith.constant 0 : i32
    return %c0_i32, %c0_i32_0 : i32, i32
  }
  func.func @transform_3(%arg0: i32) -> (i32, i32) {
    %c0_i32 = arith.constant 0 : i32
    %c0_i32_0 = arith.constant 0 : i32
    return %arg0, %c0_i32 : i32, i32
  }
}

</mosaic_0001>

<bundles_post_ra>
// kernel: tpu_custom_call.1
= control target key start
LH: loop header
LB: loop body
LE: loop exit
PB: predicated region body
PF: predicated region fallthrough
CT: control target
= control target key end

     0   :  { %8 = vsyncpa [#allocation3], 0  ;;  %s1515_s0 = inlined_call_operand.hbm [shape: f32[16,512], index: 0, kind: input, shape index: {}]   ;;  %s1516_s1 = inlined_call_operand.hbm [shape: f32[3,3,512], index: 1, kind: input, shape index: {}]   ;;  %s1517_s2 = inlined_call_operand.hbm [shape: f32[1,512], index: 2, kind: input, shape index: {}]   ;;  %s1518_s3 = inlined_call_operand.hbm [shape: f32[16,512], index: 3, kind: output, shape index: {}]  }
   0x1   :  { %9 = vsyncpa [#allocation6], 0 }
   0x2   :  { %10 = vsyncpa [#allocation4], 0 }
   0x3   :  { %12 = vsyncpa [#allocation4 + $0x1], 0  ;;  %s1057_s12 = smov 0   ;;  %s1059_s13 = smov 0  }
   0x4   :  { %s1061_s14 = smov 0   ;;  %s1063_s15 = smov 0  }
   0x5 LB: > { %s1078_s16 = sadd.s32 4294967295, %s1026_s15   ;;  %s763_s17 = sadd.s32 4294967294, %s1026_s15   ;;  %s1026_s15 = sphi %s1063_s15, %s1526_s15   ;;  %s1022_s14 = sphi %s1061_s14, %s1525_s14   ;;  %s1018_s13 = sphi %s1059_s13, %s1524_s13   ;;  %s1014_s12 = sphi %s1057_s12, %s1523_s12  }
   0x6   : > { %s1082_s18 = sadd.s32 1, %s1026_s15   ;;  %s88_s19 = sadd.s32 1, %s1022_s14 }
   0x7   : > { %s85_s20 = ssub.s32 %s1026_s15, %s1082_s18  ;;  %p98_p0 = scmp.ne.s32.totalorder %s1022_s14, %s1018_s13 }
   0x8   : > { %p86_p1 = scmp.eq.s32.totalorder %s85_s20, 0  ;;  %p99_p2 = scmp.eq.s32.totalorder %s1078_s16, 1 }
   0x9   : > { %p104_p3 = scmp.ne.s32.totalorder %s1018_s13, %s1014_s12  ;;  %p105_p4 = scmp.eq.s32.totalorder %s763_s17, 1 }
   0xa   : > { %s1093_s21 = scalar_select %p86_p1, %s1022_s14, %s88_s19  }
   0xb   : > { %p1095_p5 = por %p99_p2, %p98_p0  ;;  %p1099_p6 = por %p105_p4, %p104_p3 }
   0xc   : > { %p764_p7 = scmp.ge.s32.totalorder %s1026_s15, 1  ;;  %p112_p8 = scmp.lt.s32.totalorder %s1026_s15, 3 }
   0xd   : > { %p818_p9 = scmp.eq.s32.totalorder %s1078_s16, 0  ;;  %s137_s27 = sshll.u32 %s1516_s1, 4  ;;  %s138_s27 = int_to_ptr.hbm [resolvable:$true] %s137_s27 }
   0xe   : > { %p1106_p10 = pnand %p764_p7, %p112_p8  ;;  %s1028_s28 = smov [#allocation5]  }
   0xf   : > { %s139_s29 = sshll.u32 %s1028_s28, 4  ;;  %s123_s6 = sshll.u32 %s1515_s0, 4  ;;  %s140_s29 = int_to_ptr.vmem [resolvable:$true] %s139_s29  ;;  %s124_s6 = int_to_ptr.hbm [resolvable:$true] %s123_s6 }
  0x10   : > { %p804_p11 = pneg %p1106_p10  ;;  %s1029_s7 = smov 256  }
  0x11   : > { %s1030_s8 = smov 16   ;;  %s1031_s9 = smov [#allocation2]  }
  0x12   : > { %p1117_p12 = pnand %p818_p9, %p804_p11  ;;  %s125_s10 = sshll.u32 %s1031_s9, 4  ;;  %s126_s10 = int_to_ptr.vmem [resolvable:$true] %s125_s10 }
  0x13   : > { %s1032_s11 = smov 512   ;;  %s1033_s17 = smov 32  }
  0x14   : > { %810 = dma.hbm_to_vmem [thread:$0]  (!%p1117_p12), %s138_s27, 768, %s140_s29, [#allocation6], %s1029_s7, %s1029_s7, %s1030_s8  }
  0x15   : > { %807 = dma.hbm_to_vmem [thread:$0]  (!%p1117_p12), %s124_s6, 1024, %s126_s10, [#allocation3], %s1032_s11, %s1032_s11, %s1033_s17  }
  0x16   : > { %s152_s25 = sshll.u32 %s1517_s2, 4  ;;  %s1034_s26 = smov [#allocation7]   ;;  %s153_s25 = int_to_ptr.hbm [resolvable:$true] %s152_s25 }
  0x17   : > { %s154_s28 = sshll.u32 %s1034_s26, 4  ;;  %167 = sbr.rel (%p1106_p10) target bundleno = 227 (0xe3), region = 32  ;;  %s155_s28 = int_to_ptr.vmem [resolvable:$true] %s154_s28 }
  0x18   : > { %813 = dma.hbm_to_vmem [thread:$0]  (!%p1117_p12), %s153_s25, 64, %s155_s28, [#allocation6]  }
  0x1c   : > { %1001 = dma.done.wait (%p818_p9), [#allocation3], 1024  }
  0x1d   : > { %1003 = vsyncadd (%p818_p9), [#allocation3], 4294966272 }
  0x1e   : > { %1005 = dma.done.wait (%p818_p9), [#allocation6], 832  }
  0x1f   : > { %1007 = vsyncadd (%p818_p9), [#allocation6], 4294966464  ;;  %s773_s27 = sshll.u32 %s1078_s16, 3  ;;  %vm271_vm1 = vcmask 1040384   ;;  %s1035_s26 = smov 32   ;;  %vm394_vm3 = vcmask 1046528   ;;  %v295_v60 = vlaneseq }
  0x20   : > { %s198_s29 = sshra.s32 %s773_s27, 3  ;;  %s776_s30 = sadd.s32 4294967295, %s773_s27  ;;  %vm525_vm4 = vcmask 1045504   ;;  %v1234_v59 = vld [vmem:[#allocation5] sm:$0x77] }
  0x21   : > { %s786_s4 = sshll.u32 %s198_s29, 5  ;;  %p208_p13 = scmp.gt.s32.totalorder %s776_s30, 0  ;;  %v1236_v61 = vld [vmem:[#allocation5 + $0x10] sm:$0x77]  ;;  %v366_v62 = vperm.slane %v1234_v59, 2 }
  0x22   : > { %p219_p0 = scmp.gt.s32.totalorder %s773_s27, 0  ;;  %s202_s7 = scalar_lea.vmem [#allocation2], %s786_s4  ;;  %v1239_v63 = vld [vmem:[#allocation5 + $0x8] sm:$0x77] }
  0x23   : > { %s1528_s30 = smov (!%p208_p13, %s776_s30), 0  ;;  %v205_v0 = vld [vmem:[%s202_s7 + $0x10] sm:$0xff]  ;;  %v203_v2 = vld [vmem:[%s202_s7] sm:$0xff]  ;;  %s224_s10 = sadd.s32 8, %s773_s27  ;;  %v206_v9 = vld [vmem:[%s202_s7 + $0x18] sm:$0xff] }
  0x24   : > { %s220_s24 = scalar_select %p219_p0, 1, 0  ;;  %v256_v4 = vrot.slane %v205_v0, 7  ;;  %v254_v5 = vrot.slane %v203_v2, 7  ;;  %v204_v10 = vld [vmem:[%s202_s7 + $0x8] sm:$0xff]  ;;  %v257_v13 = vrot.slane %v206_v9, 7 }
  0x25   : > { %s210_s5 = sshra.s32 %s1528_s30, 3  ;;  %s213_s6 = sand.u32 7, %s1528_s30  ;;  %v255_v17 = vrot.slane %v204_v10, 7  ;;  %v457_v0 = vperm.slane %v1236_v61, 1  ;;  %v346_v2 = vperm.slane %v1234_v59, 1  ;;  %v318_v9 = vperm.slane %v1234_v59, 4 }
  0x26   : > { %s787_s8 = sshll.u32 %s210_s5, 5  ;;  %v221_v1 = vstv %s220_s24  ;;  %p225_p1 = scmp.lt.s32.totalorder %s224_s10, 15 }
  0x27   : > { %s216_s9 = sadd.s32 %s787_s8, %s213_s6  ;;  %vm222_vm0 = vcmp.eq.s32.totalorder %v221_v1, 1  ;;  %p236_p2 = scmp.lt.s32.totalorder %s224_s10, 16  ;;  %v1242_v1 = vand.u32 127, %v295_v60 }
  0x28   : > { %s217_s11 = scalar_lea.vmem [#allocation2], %s216_s9  ;;  %s1530_s10 = smov (!%p225_p1, %s224_s10), 15 }
  0x29   : > { %v218_v3 = vld [vmem:[%s217_s11] ss:$8 sm:$0xf]  ;;  %s237_s17 = scalar_select %p236_p2, 1, 0  ;;  %vm310_vm5 = vcmp.lt.s32.totalorder %v1242_v1, 96 }
  0x2a   : > { %v223_v6 = vsel %vm222_vm0, %v218_v3, 0.0  ;;  %s227_s19 = sshra.s32 %s1530_s10, 3  ;;  %s230_s20 = sand.u32 7, %s1530_s10  ;;  %v1245_v3 = vld [vmem:[#allocation7] sm:$0xf]  ;;  %vm297_vm6 = vcmp.lt.s32.totalorder %v1242_v1, 32 }
  0x2b   : > { %v244_v7 = vperm.slane %v223_v6, 2  ;;  %v242_v8 = vperm.slane %v223_v6, 0  ;;  %s788_s25 = sshll.u32 %s227_s19, 5  ;;  %v238_v14 = vstv %s237_s17  ;;  %v245_v15 = vperm.slane %v223_v6, 3  ;;  %s1036_s27 = smov 96  }
  0x2c   : > { %s233_s28 = sadd.s32 %s788_s25, %s230_s20  ;;  %v243_v16 = vperm.slane %v223_v6, 1  ;;  %vm239_vm2 = vcmp.eq.s32.totalorder %v238_v14, 1  ;;  %v374_v6 = vperm.slane %v366_v62, 2  ;;  %v368_v62 = vperm.slane %v1239_v63, 2  ;;  %s194_s30 = sand.u32 1, %s1018_s13  }
  0x2d   : > { %v1145_v11 = vsel %vm271_vm1, %v244_v7, %v256_v4  ;;  %v1148_v12 = vsel %vm271_vm1, %v242_v8, %v254_v5  ;;  %s234_s29 = scalar_lea.vmem [#allocation2], %s233_s28  ;;  %v1157_v21 = vsel %vm271_vm1, %v245_v15, %v257_v13  ;;  %v320_v7 = vperm.slane %v1239_v63, 4  ;;  %s772_s4 = sshll.u32 %s194_s30, 5 }
  0x2e   : > { %291 = vrot.lane.b32.xlu1 %v1145_v11, %s1035_s26  ;;  %287 = vrot.lane.b32.xlu0 %v1148_v12, %s1035_s26  ;;  %v235_v18 = vld [vmem:[%s234_s29] ss:$8 sm:$0xf]  ;;  %v1160_v22 = vsel %vm271_vm1, %v243_v16, %v255_v17  ;;  %v395_v26 = vrot.slane %v1148_v12, 1  ;;  %v401_v33 = vrot.slane %v1145_v11, 1  ;;  %v404_v37 = vrot.slane %v1157_v21, 1 }
  0x2f   : > { %302 = vrot.lane.b32.xlu2 %v1148_v12, %s1036_s27  ;;  %v240_v19 = vsel %vm239_vm2, %v235_v18, 0.0  ;;  %v398_v35 = vrot.slane %v1160_v22, 1  ;;  %v526_v42 = vrot.slane %v1148_v12, 2  ;;  %v529_v44 = vrot.slane %v1160_v22, 2  ;;  %s789_s24 = sshll.u32 %s1078_s16, 5  ;;  %s196_s16 = scalar_lea.vmem [#allocation8], %s772_s4 }
  0x30   : > { %v263_v20 = vperm.slane %v240_v19, 0  ;;  %v265_v24 = vperm.slane %v240_v19, 2  ;;  %v264_v25 = vperm.slane %v240_v19, 1  ;;  %v266_v28 = vperm.slane %v240_v19, 3  ;;  %s672_s7 = scalar_lea.hbm %s1518_s3, %s789_s24  ;;  %s674_s8 = sshll.u32 %s196_s16, 4  ;;  %s675_s8 = int_to_ptr.vmem [resolvable:$true] %s674_s8 }
  0x31   : > { %v535_v48 = vrot.slane %v1157_v21, 2  ;;  %v532_v50 = vrot.slane %v1145_v11, 2  ;;  %v347_v15 = vperm.slane %v1234_v59, 5  ;;  %v348_v16 = vperm.slane %v1239_v63, 1  ;;  %s676_s9 = sshll.u32 %s672_s7, 4  ;;  %s661_s10 = scalar_lea.sflag [#allocation4], %s194_s30  ;;  %s677_s9 = int_to_ptr.hbm [resolvable:$true] %s676_s9 }
  0x32   : > { %v1163_v23 = vsel %vm271_vm1, %v254_v5, %v263_v20  ;;  %v1174_v29 = vsel %vm271_vm1, %v256_v4, %v265_v24  ;;  %v1177_v30 = vsel %vm271_vm1, %v255_v17, %v264_v25  ;;  %v1181_v32 = vsel %vm271_vm1, %v257_v13, %v266_v28  ;;  %v1260_v17 = vld [vmem:[#allocation5 + $0x18] sm:$0x77]  ;;  %s970_s11 = sshra.s32 %s677_s9, 4  ;;  %s976_s25 = scalar_lea.hbm %s1518_s3, 64  ;;  %s971_s11 = int_to_ptr.hbm [resolvable:$true] %s970_s11 }
  0x33   : > { %v396_v27 = vrot.slane %v1163_v23, 1  ;;  %v402_v34 = vrot.slane %v1174_v29, 1  ;;  %v399_v36 = vrot.slane %v1177_v30, 1  ;;  %v405_v38 = vrot.slane %v1181_v32, 1  ;;  %s972_s17 = scalar_lea.hbm %s971_s11, 32  ;;  %p977_p8 = scmp.lt.s32.totalorder %s971_s11, %s1518_s3 }
  0x34   : > { %v527_v43 = vrot.slane %v1163_v23, 2  ;;  %v530_v45 = vrot.slane %v1177_v30, 2  ;;  %v536_v49 = vrot.slane %v1181_v32, 2  ;;  %v533_v51 = vrot.slane %v1174_v29, 2  ;;  %p973_p3 = scmp.ne.s32.totalorder %s971_s11, %s972_s17  ;;  %p978_p9 = scmp.lt.s32.totalorder %s976_s25, %s972_s17 }
  0x35   : > { %v397_v31 = vsel %vm394_vm3, %v395_v26, %v396_v27  ;;  %v403_v39 = vsel %vm394_vm3, %v401_v33, %v402_v34  ;;  %v400_v40 = vsel %vm394_vm3, %v398_v35, %v399_v36  ;;  %v406_v41 = vsel %vm394_vm3, %v404_v37, %v405_v38 }
  0x36   : > { %293 = vrot.lane.b32.xlu1 %v1157_v21, %s1035_s26  ;;  %289 = vrot.lane.b32.xlu0 %v1160_v22, %s1035_s26  ;;  %v528_v46 = vsel %vm525_vm4, %v526_v42, %v527_v43  ;;  %v531_v47 = vsel %vm525_vm4, %v529_v44, %v530_v45  ;;  %v537_v52 = vsel %vm525_vm4, %v535_v48, %v536_v49  ;;  %v317_v4 = vperm.slane %v1234_v59, 0  ;;  %p974_p4 = pnand %p973_p3, %p1095_p5  ;;  %p979_p10 = por %p978_p9, %p977_p8 }
  0x37   : > { %304 = vrot.lane.b32.xlu2 %v1160_v22, %s1036_s27  ;;  %v534_v53 = vsel %vm525_vm4, %v532_v50, %v533_v51  ;;  %v349_v5 = vperm.slane %v1239_v63, 5  ;;  %v319_v13 = vperm.slane %v1239_v63, 0  ;;  %v465_v18 = vperm.slane %v457_v0, 1 }
  0x38   : > { %v334_v19 = vperm.slane %v1245_v3, 0  ;;  %v354_v20 = vperm.slane %v346_v2, 1  ;;  %v325_v24 = vperm.slane %v317_v4, 0  ;;  %v337_v25 = vperm.slane %v1245_v3, 3  ;;  %p975_p7 = pneg %p974_p4 }
  0x39   : > { %v357_v26 = vperm.slane %v349_v5, 1  ;;  %v458_v27 = vperm.slane %v1236_v61, 5  ;;  %v328_v28 = vperm.slane %v320_v7, 0  ;;  %v459_v33 = vperm.slane %v1260_v17, 1 }
  0x3a   : > { %v460_v34 = vperm.slane %v1260_v17, 5  ;;  %v1269_v35 = vperm.slane %v319_v13, 0  ;;  %v355_v36 = vperm.slane %v347_v15, 1  ;;  %v356_v37 = vperm.slane %v348_v16, 1  ;;  %p980_p11 = pnand %p979_p10, %p975_p7 }
  0x3b   : > { %v469_v38 = vmul.f32 %v465_v18, %v1148_v12  ;;  %v473_v42 = vmul.f32 %v465_v18, %v1163_v23  ;;  %v437_v43 = vperm.slane %v1236_v61, 0  ;;  %v1278_v44 = vmul.f32 %v357_v26, %v1157_v21 }
  0x3c   : > { %v369_v45 = vperm.slane %v1239_v63, 6  ;;  %v367_v49 = vperm.slane %v1234_v59, 6  ;;  %v467_v51 = vperm.slane %v459_v33, 1  ;;  %v1294_v60 = vmul.f32 %v356_v37, %v1145_v11 }
  0x3d   : > { %v485_v2 = vrot.slane %v469_v38, 1  ;;  %v440_v4 = vperm.slane %v1260_v17, 4  ;;  %v438_v5 = vperm.slane %v1236_v61, 4  ;;  %v486_v7 = vrot.slane %v473_v42, 1 }
  0x3e   : > { %308 = vrot.lane.b32.xlu1 %v1157_v21, %s1036_s27  ;;  %306 = vrot.lane.b32.xlu0 %v1145_v11, %s1036_s27  ;;  %v445_v13 = vperm.slane %v437_v43, 0  ;;  %v1305_v15 = vperm.slane %v369_v45, 2  ;;  %v1308_v63 = vperm.slane %v367_v49, 2  ;;  %v1313_v33 = vperm.slane %v368_v62, 2 }
  0x3f   : > { %411 = vrot.lane.b32.xlu2 %v397_v31, %s1035_s26  ;;  %v1319_v37 = vperm.slane %v440_v4, 0  ;;  %v439_v38 = vperm.slane %v1260_v17, 0  ;;  %v1322_v42 = vperm.slane %v438_v5, 0  ;;  %v1325_v43 = vsel %vm394_vm3, %v485_v2, %v486_v7 }
  0x46   : > { %415 = vrot.lane.b32.xlu1 %v403_v39, %s1035_s26  ;;  %413 = vrot.lane.b32.xlu0 %v400_v40, %s1035_s26 }
  0x47   : > { %417 = vrot.lane.b32.xlu2 %v406_v41, %s1035_s26 }
  0x4e   : > { %425 = vrot.lane.b32.xlu1 %v400_v40, %s1036_s27  ;;  %423 = vrot.lane.b32.xlu0 %v397_v31, %s1036_s27  ;;  %v326_v31 = vperm.slane %v318_v9, 0  ;;  %v335_v40 = vperm.slane %v1245_v3, 1 }
  0x4f   : > { %427 = vrot.lane.b32.xlu2 %v403_v39, %s1036_s27  ;;  %v358_v39 = vmul.f32 %v354_v20, %v1148_v12  ;;  %v471_v20 = vmul.f32 %v467_v51, %v1145_v11 }
  0x51   : > { %v491_v62 = vrot.slane %v471_v20, 1 }
  0x56   : > { %542 = vrot.lane.b32.xlu1 %v528_v46, %s1035_s26  ;;  %429 = vrot.lane.b32.xlu0 %v406_v41, %s1036_s27  ;;  %v336_v41 = vperm.slane %v1245_v3, 2 }
  0x57   : > { %544 = vrot.lane.b32.xlu2 %v531_v47, %s1035_s26 }
  0x5e   : > { %548 = vrot.lane.b32.xlu1 %v537_v52, %s1035_s26  ;;  %546 = vrot.lane.b32.xlu0 %v534_v53, %s1035_s26 }
  0x5f   : > { %554 = vrot.lane.b32.xlu2 %v528_v46, %s1036_s27  ;;  %v466_v46 = vperm.slane %v458_v27, 1 }
  0x61   : > { %v470_v16 = vmul.f32 %v466_v46, %v1160_v22  ;;  %v474_v18 = vmul.f32 %v466_v46, %v1177_v30 }
  0x66   : > { %558 = vrot.lane.b32.xlu1 %v534_v53, %s1036_s27  ;;  %556 = vrot.lane.b32.xlu0 %v531_v47, %s1036_s27  ;;  %v1291_v53 = vmul.f32 %v355_v36, %v1160_v22 }
  0x67   : > { %560 = vrot.lane.b32.xlu2 %v537_v52, %s1036_s27  ;;  %v468_v52 = vperm.slane %v460_v34, 1  ;;  %v1315_v34 = vld [vmem:[#allocation5 + $0x20] sm:$0x77] }
  0x68   : > { %v589_v2 = vperm.slane %v1315_v34, 5 }
  0x69   : > { %v472_v26 = vmul.f32 %v468_v52, %v1157_v21  ;;  %v476_v36 = vmul.f32 %v468_v52, %v1181_v32  ;;  %v489_v52 = vrot.slane %v474_v18, 1  ;;  %v1346_v18 = vld [vmem:[#allocation5 + $0x28] sm:$0x77] }
  0x6b   : > { %v495_v5 = vrot.slane %v476_v36, 1 }
  0x89   : > { %v1224_v54 = vpop.permute.xlu2 %302 }
  0x91   : > { %v1226_v55 = vpop.permute.xlu2 %304 }
  0x92   : > { %v313_v59 = vsel %vm310_vm5, %v1224_v54, %v1226_v55 }
  0x93   : > { %v378_v27 = vmul.f32 %v374_v6, %v313_v59  ;;  %v494_v59 = vrot.slane %v472_v26, 1 }
  0x99   : > { %v1228_v56 = vpop.permute.xlu2 %411 }
  0xa0   : > { %v1230_v57 = vpop.permute.xlu1 %291  ;;  %v1232_v58 = vpop.permute.xlu0 %287 }
  0xa1   : > { %v1256_v14 = vpop.permute.xlu2 %417 }
  0xa8   : > { %v1250_v8 = vpop.permute.xlu1 %293  ;;  %v1253_v10 = vpop.permute.xlu0 %289 }
  0xa9   : > { %v301_v47 = vsel %vm297_vm6, %v1250_v8, %v1232_v58  ;;  %v1297_v0 = vpop.permute.xlu2 %427  ;;  %v298_v6 = vsel %vm297_vm6, %v1230_v57, %v1250_v8  ;;  %v300_v46 = vsel %vm297_vm6, %v1232_v58, %v1253_v10  ;;  %v299_v4 = vsel %vm297_vm6, %v1253_v10, %v1230_v57 }
  0xaa   : > { %v329_v9 = vmul.f32 %v325_v24, %v301_v47  ;;  %v475_v24 = vmul.f32 %v467_v51, %v1174_v29  ;;  %v488_v47 = vrot.slane %v470_v16, 1  ;;  %v506_v8 = vperm.slane %v1236_v61, 6 }
  0xab   : > { %v332_v7 = vmul.f32 %v328_v28, %v298_v6  ;;  %v422_v58 = vsel %vm297_vm6, %v1256_v14, %v1228_v56  ;;  %v505_v16 = vperm.slane %v1236_v61, 2  ;;  %v569_v57 = vperm.slane %v1315_v34, 4 }
  0xac   : > { %v342_v45 = vadd.f32 %v334_v19, %v329_v9  ;;  %v492_v19 = vrot.slane %v475_v24, 1  ;;  %v330_v9 = vmul.f32 %v326_v31, %v300_v46  ;;  %v507_v10 = vperm.slane %v1260_v17, 2 }
  0xad   : > { %v508_v24 = vperm.slane %v1260_v17, 6  ;;  %v331_v28 = vmul.f32 %v1269_v35, %v299_v4  ;;  %v447_v31 = vperm.slane %v439_v38, 0  ;;  %v1355_v36 = vsel %vm394_vm3, %v488_v47, %v489_v52 }
  0xae   : > { %v362_v20 = vadd.f32 %v358_v39, %v342_v45  ;;  %v597_v6 = vperm.slane %v589_v2, 1  ;;  %v1357_v46 = vperm.slane %v506_v8, 2  ;;  %v1360_v61 = vsel %vm394_vm3, %v491_v62, %v492_v19 }
  0xaf   : > { %v1363_v39 = vsel %vm394_vm3, %v494_v59, %v495_v5  ;;  %v591_v45 = vperm.slane %v1346_v18, 5  ;;  %v345_v17 = vadd.f32 %v337_v25, %v332_v7  ;;  %v343_v35 = vadd.f32 %v335_v40, %v330_v9 }
  0xb0   : > { %v1285_v48 = vpop.permute.xlu1 %308  ;;  %v1288_v50 = vpop.permute.xlu0 %306  ;;  %v449_v38 = vmul.f32 %v445_v13, %v422_v58  ;;  %v1370_v47 = vperm.slane %v505_v16, 2  ;;  %v382_v52 = vadd.f32 %v378_v27, %v362_v20  ;;  %v1372_v2 = vperm.slane %v569_v57, 0 }
  0xb1   : > { %v1348_v26 = vpop.permute.xlu2 %544  ;;  %v1374_v4 = vperm.slane %v507_v10, 2  ;;  %v1376_v62 = vperm.slane %v508_v24, 2  ;;  %v344_v59 = vadd.f32 %v336_v41, %v331_v28  ;;  %v568_v25 = vperm.slane %v1315_v34, 0 }
  0xb2   : > { %v1382_v5 = vmul.f32 %v597_v6, %v1160_v22  ;;  %v1385_v40 = vmul.f32 %v597_v6, %v1177_v30  ;;  %v314_v13 = vsel %vm310_vm5, %v1285_v48, %v1224_v54  ;;  %v311_v3 = vsel %vm310_vm5, %v1288_v50, %v1285_v48 }
  0xb3   : > { %v312_v41 = vsel %vm310_vm5, %v1226_v55, %v1288_v50  ;;  %v599_v22 = vperm.slane %v591_v45, 1  ;;  %v365_v27 = vadd.f32 %v1278_v44, %v345_v17  ;;  %v363_v30 = vadd.f32 %v1291_v53, %v343_v35 }
  0xb4   : > { %v590_v7 = vperm.slane %v1346_v18, 1  ;;  %v588_v9 = vperm.slane %v1315_v34, 1  ;;  %v453_v54 = vadd.f32 %v449_v38, %v382_v52  ;;  %v570_v58 = vperm.slane %v1346_v18, 0 }
  0xb5   : > { %v571_v16 = vperm.slane %v1346_v18, 4  ;;  %v639_v48 = vperm.slane %v1346_v18, 6  ;;  %v381_v20 = vmul.f32 %v1305_v15, %v314_v13  ;;  %v379_v55 = vmul.f32 %v1308_v63, %v312_v41 }
  0xb6   : > { %v380_v50 = vmul.f32 %v1313_v33, %v311_v3  ;;  %v603_v24 = vmul.f32 %v599_v22, %v1157_v21  ;;  %v607_v15 = vmul.f32 %v599_v22, %v1181_v32  ;;  %v364_v63 = vadd.f32 %v1294_v60, %v344_v59 }
  0xb7   : > { %v576_v33 = vperm.slane %v568_v25, 0  ;;  %v598_v28 = vperm.slane %v590_v7, 1  ;;  %v596_v6 = vperm.slane %v588_v9, 1  ;;  %v578_v45 = vperm.slane %v570_v58, 0 }
  0xb8   : > { %v416_v49 = vpop.permute.xlu1 %415  ;;  %v414_v51 = vpop.permute.xlu0 %413  ;;  %v579_v17 = vperm.slane %v571_v16, 0  ;;  %v1423_v35 = vperm.slane %v639_v48, 2  ;;  %v383_v38 = vadd.f32 %v379_v55, %v363_v30  ;;  %v384_v13 = vadd.f32 %v380_v50, %v364_v63 }
  0xb9   : > { %v421_v44 = vsel %vm297_vm6, %v1228_v56, %v414_v51  ;;  %v419_v53 = vsel %vm297_vm6, %v416_v49, %v1256_v14  ;;  %v420_v57 = vsel %vm297_vm6, %v414_v51, %v416_v49  ;;  %v1417_v10 = vpop.permute.xlu2 %554  ;;  %v385_v14 = vadd.f32 %v381_v20, %v365_v27 }
  0xba   : > { %v450_v56 = vmul.f32 %v1322_v42, %v421_v44  ;;  %v452_v49 = vmul.f32 %v1319_v37, %v419_v53  ;;  %v451_v51 = vmul.f32 %v447_v31, %v420_v57  ;;  %v501_v32 = vadd.f32 %v1325_v43, %v453_v54 }
  0xbb   : > { %v625_v60 = vrot.slane %v603_v24, 2  ;;  %v626_v59 = vrot.slane %v607_v15, 2  ;;  %v602_v25 = vmul.f32 %v598_v28, %v1145_v11  ;;  %v606_v3 = vmul.f32 %v598_v28, %v1174_v29 }
  0xbc   : > { %v638_v41 = vperm.slane %v1346_v18, 2  ;;  %v454_v22 = vadd.f32 %v450_v56, %v383_v38  ;;  %v600_v31 = vmul.f32 %v596_v6, %v1148_v12  ;;  %v604_v43 = vmul.f32 %v596_v6, %v1163_v23 }
  0xbd   : > { %v456_v27 = vadd.f32 %v452_v49, %v385_v14  ;;  %v455_v30 = vadd.f32 %v451_v51, %v384_v13  ;;  %v619_v11 = vrot.slane %v1382_v5, 2  ;;  %v627_v12 = vsel %vm525_vm4, %v625_v60, %v626_v59 }
  0xbe   : > { %v622_v54 = vrot.slane %v602_v25, 2  ;;  %v623_v58 = vrot.slane %v606_v3, 2  ;;  %v620_v16 = vrot.slane %v1385_v40, 2  ;;  %v616_v24 = vrot.slane %v600_v31, 2 }
  0xbf   : > { %v504_v55 = vadd.f32 %v1363_v39, %v456_v27  ;;  %v617_v15 = vrot.slane %v604_v43, 2  ;;  %v646_v56 = vperm.slane %v638_v41, 2 }
  0xc0   : > { %v426_v8 = vpop.permute.xlu1 %425  ;;  %v424_v19 = vpop.permute.xlu0 %423  ;;  %v624_v14 = vsel %vm525_vm4, %v622_v54, %v623_v58 }
  0xc1   : > { %v432_v42 = vsel %vm310_vm5, %v426_v8, %v1297_v0  ;;  %v433_v18 = vsel %vm310_vm5, %v424_v19, %v426_v8  ;;  %v561_v5 = vpop.permute.xlu2 %560  ;;  %v636_v8 = vperm.slane %v1315_v34, 2 }
  0xc2   : > { %v518_v29 = vmul.f32 %v1357_v46, %v432_v42  ;;  %v517_v48 = vmul.f32 %v1370_v47, %v433_v18  ;;  %v565_v57 = vsel %vm310_vm5, %v561_v5, %v1417_v10 }
  0xc3   : > { %v651_v49 = vmul.f32 %v1423_v35, %v565_v57 }
  0xc4   : > { %v521_v63 = vadd.f32 %v517_v48, %v501_v32 }
  0xc8   : > { %v543_v52 = vpop.permute.xlu1 %542  ;;  %v430_v21 = vpop.permute.xlu0 %429 }
  0xc9   : > { %v434_v37 = vsel %vm310_vm5, %v430_v21, %v424_v19  ;;  %v431_v7 = vsel %vm310_vm5, %v1297_v0, %v430_v21  ;;  %v552_v9 = vsel %vm297_vm6, %v543_v52, %v1348_v26  ;;  %v502_v0 = vadd.f32 %v1355_v36, %v454_v22 }
  0xca   : > { %v520_v23 = vmul.f32 %v1376_v62, %v434_v37  ;;  %v519_v46 = vmul.f32 %v1374_v4, %v431_v7  ;;  %v637_v19 = vperm.slane %v1315_v34, 6  ;;  %v581_v20 = vmul.f32 %v1372_v2, %v552_v9 }
  0xcb   : > { %v503_v62 = vadd.f32 %v1360_v61, %v455_v30  ;;  %v522_v44 = vadd.f32 %v518_v29, %v502_v0 }
  0xcc   : > { %v524_v47 = vadd.f32 %v520_v23, %v504_v55  ;;  %v645_v51 = vperm.slane %v637_v19, 2 }
  0xcd   : > { %v523_v53 = vadd.f32 %v519_v46, %v503_v62  ;;  %v585_v28 = vadd.f32 %v581_v20, %v522_v44 }
  0xd0   : > { %v549_v50 = vpop.permute.xlu1 %548  ;;  %v547_v40 = vpop.permute.xlu0 %546 }
  0xd1   : > { %v553_v36 = vsel %vm297_vm6, %v549_v50, %v543_v52  ;;  %v550_v4 = vsel %vm297_vm6, %v547_v40, %v549_v50  ;;  %v551_v34 = vsel %vm297_vm6, %v1348_v26, %v547_v40  ;;  %v618_v52 = vsel %vm525_vm4, %v616_v24, %v617_v15 }
  0xd2   : > { %v580_v2 = vmul.f32 %v576_v33, %v553_v36  ;;  %v582_v61 = vmul.f32 %v578_v45, %v551_v34  ;;  %v583_v39 = vmul.f32 %v579_v17, %v550_v4  ;;  %v621_v33 = vsel %vm525_vm4, %v619_v11, %v620_v16 }
  0xd3   : > { %v644_v45 = vperm.slane %v636_v8, 2  ;;  %v633_v60 = vadd.f32 %v621_v33, %v585_v28 }
  0xd4   : > { %v587_v6 = vadd.f32 %v583_v39, %v524_v47  ;;  %v586_v26 = vadd.f32 %v582_v61, %v523_v53  ;;  %v584_v17 = vadd.f32 %v580_v2, %v521_v63 }
  0xd6   : > { %v635_v38 = vadd.f32 %v627_v12, %v587_v6  ;;  %v634_v42 = vadd.f32 %v624_v14, %v586_v26  ;;  %v632_v41 = vadd.f32 %v618_v52, %v584_v17 }
  0xd8   : > { %v655_v21 = vadd.f32 %v651_v49, %v635_v38  ;;  %v559_v13 = vpop.permute.xlu1 %558  ;;  %v557_v32 = vpop.permute.xlu0 %556 }
  0xd9   : > { %v562_v59 = vsel %vm310_vm5, %v559_v13, %v561_v5  ;;  %v563_v25 = vsel %vm310_vm5, %v557_v32, %v559_v13  ;;  %v564_v35 = vsel %vm310_vm5, %v1417_v10, %v557_v32 }
  0xda   : > { %659 = vst [vmem:[%s196_s16 + $0x18] sm:$0xff] %v655_v21  ;;  %v650_v3 = vmul.f32 %v646_v56, %v562_v59  ;;  %v648_v22 = vmul.f32 %v644_v45, %v564_v35  ;;  %v649_v37 = vmul.f32 %v645_v51, %v563_v25 }
  0xdc   : > { %v654_v31 = vadd.f32 %v650_v3, %v634_v42  ;;  %v652_v43 = vadd.f32 %v648_v22, %v632_v41  ;;  %v653_v27 = vadd.f32 %v649_v37, %v633_v60 }
  0xde   : > { %658 = vst [vmem:[%s196_s16 + $0x10] sm:$0xff] %v654_v31 }
  0xdf   : > { %656 = vst [vmem:[%s196_s16] sm:$0xff] %v652_v43 }
  0xe0   : > { %657 = vst [vmem:[%s196_s16 + $0x8] sm:$0xff] %v653_v27 }
  0xe1   : > { %983 = shalt.err (!%p980_p11)
}
  0xe2   : > { %802 = dma.vmem_to_hbm [thread:$0]  (%p1095_p5), %s675_s8, 512, %s677_s9, %s661_s10  }
  0xe3 PF: > { %p824_p12 = scmp.ge.s32.totalorder %s1026_s15, 2  ;;  %s688_s27 = sand.u32 1, %s1014_s12  }
  0xe4   : > { %s689_s29 = scalar_lea.sflag [#allocation4], %s688_s27 }
  0xe5   : > { %p815_p13 = pnand %p824_p12, %p1099_p6 }
  0xe7   : > { %p816_p0 = pneg %p815_p13 }
  0xe9   : > { %1009 = dma.done.wait (%p816_p0), %s689_s29, 512  }
  0xea   : > { %1011 = vsyncadd (%p816_p0), %s689_s29, 4294966784  ;;  %p15_p1 = scmp.ge.s32.totalorder %s1082_s18, 4   ;;  %s1523_s12 = smov %s1018_s13 }
  0xeb   : > { %s1524_s13 = smov %s1022_s14  ;;  %s1525_s14 = smov %s1093_s21 }
  0xec   : > { %s1526_s15 = smov %s1082_s18  ;;  %17 = sbr.rel (!%p15_p1) target bundleno = 5 (0x5), region = 80 }
  0xf1   :  { %695 = vsyncpa [#allocation3], 1 }
  0xf2   :  { %697 = vsyncpa [#allocation3 + $0x1], 1 }
  0xf3   :  { %698 = vsyncpa [#allocation6], 1 }
  0xf4   :  { %699 = vsyncpa [#allocation4], 1 }
  0xf5   :  { %701 = vsyncpa [#allocation4 + $0x1], 1 }

</bundles_post_ra>
